<compile_context>
chip_gen: v6e
topology: v6e:2x2x1
jax: 0.10.0
libtpu: 0.0.40
codegen_flags: <defaults>
</compile_context>

<pallas_src>
import functools

import jax
import jax.numpy as jnp
from jax.experimental import pallas as pl
from jax.experimental.pallas import tpu as pltpu


def _round_up(n, m):
    return (n + m - 1) // m * m


def _qnet_kernel(x_ref, w1_ref, w2_ref, w3_ref, b_ref, out_ref, *, np_, zp):
    # Eval-mode forward: dropout is the identity.
    x = x_ref[...]                                    # (TB, XP) bf16

    # Single concatenated, lane-aligned bias block -> static slices.
    b1 = b_ref[:, 0:np_]                              # (1, NP) f32
    b2 = b_ref[:, np_:2 * np_]                        # (1, NP) f32
    b3 = b_ref[:, 2 * np_:2 * np_ + zp]               # (1, ZP) f32

    # lin1 + relu: bf16 operands on the MXU, f32 accumulate + f32 epilogue.
    h1 = jnp.dot(x, w1_ref[...], preferred_element_type=jnp.float32)
    h1 = jnp.maximum(h1 + b1, 0.0)

    # lin2 + relu
    h2 = jnp.dot(h1.astype(jnp.bfloat16), w2_ref[...],
                 preferred_element_type=jnp.float32)
    h2 = jnp.maximum(h2 + b2, 0.0)

    # lin3gauss (no activation)
    out = jnp.dot(h2.astype(jnp.bfloat16), w3_ref[...],
                  preferred_element_type=jnp.float32)
    out_ref[...] = (out + b3).astype(out_ref.dtype)


def prepare_params(w1, b1, w2, b2, w3, b3):
    """One-time preparation: zero-pad every feature axis to a lane multiple
    (128), cast weights to bf16, fuse the three biases into one lane-aligned
    f32 block.  Call once; reuse the result for every forward call."""
    X_dim, N = w1.shape
    z_dim = w3.shape[1]
    XP = _round_up(X_dim, 128)
    NP = _round_up(N, 128)
    ZP = _round_up(z_dim, 128)

    f32, bf16 = jnp.float32, jnp.bfloat16
    w1p = jnp.zeros((XP, NP), f32).at[:X_dim, :N].set(w1.astype(f32)).astype(bf16)
    w2p = jnp.zeros((NP, NP), f32).at[:N, :N].set(w2.astype(f32)).astype(bf16)
    w3p = jnp.zeros((NP, ZP), f32).at[:N, :z_dim].set(w3.astype(f32)).astype(bf16)

    bcat = jnp.zeros((1, 2 * NP + ZP), f32)
    bcat = bcat.at[0, :N].set(b1.astype(f32))
    bcat = bcat.at[0, NP:NP + N].set(b2.astype(f32))
    bcat = bcat.at[0, 2 * NP:2 * NP + z_dim].set(b3.astype(f32))

    dims = {"X_dim": X_dim, "N": N, "z_dim": z_dim, "XP": XP, "NP": NP, "ZP": ZP}
    return (w1p, w2p, w3p, bcat), dims


@functools.partial(jax.jit, static_argnames=("z_dim", "block_batch"))
def _q_net_forward_impl(x, w1p, w2p, w3p, bcat, *, z_dim, block_batch):
    B, X_dim = x.shape
    XP, NP = w1p.shape
    ZP = w3p.shape[1]

    # Batch tiling: whole padded batch in one step when it fits block_batch,
    # otherwise big (>=256) tiles so the 256-row MXU is filled and grid-step
    # overhead amortizes.  TB is always a multiple of 16 (bf16 sublane pack).
    TB = min(block_batch, _round_up(B, 16))
    BP = _round_up(B, TB)
    grid = (BP // TB,)

    # Per-call work: only pad/cast x (fused into this jit with the kernel).
    xp = jnp.zeros((BP, XP), jnp.float32).at[:B, :X_dim].set(
        x.astype(jnp.float32)).astype(jnp.bfloat16)

    # VMEM budget: single-buffered resident weights + double-buffered x/out
    # tiles + f32 intermediates (h1, h2).
    weights_b = (w1p.size + w2p.size + w3p.size) * 2 + bcat.size * 4
    stream_b = 2 * TB * XP * 2 + 2 * TB * ZP * 4
    interm_b = 2 * TB * NP * 4
    vmem_est = weights_b + stream_b + interm_b

    cp_kwargs = dict(dimension_semantics=("parallel",))   # 2 TCs on v7x
    # v5e's 16 MiB scoped-VMEM default is the tightest; raise it only when the
    # working set gets close, capped well under v7x's 64 MiB/TC.
    if int(vmem_est * 1.5) > (16 << 20):
        cp_kwargs["vmem_limit_bytes"] = min(int(vmem_est * 2), 56 << 20)

    flops = 2 * BP * (XP * NP + NP * NP + NP * ZP)
    bytes_accessed = xp.size * 2 + weights_b + BP * ZP * 4

    kernel = functools.partial(_qnet_kernel, np_=NP, zp=ZP)

    out = pl.pallas_call(
        kernel,
        out_shape=jax.ShapeDtypeStruct((BP, ZP), jnp.float32),
        grid=grid,
        in_specs=[
            # x: streamed per batch tile (double-buffered by default).
            pl.BlockSpec((TB, XP), lambda i: (i, 0)),
            # Weights / bias: constant index_map -> resident in VMEM;
            # Buffered(1) avoids wasting VMEM double-buffering static blocks.
            pl.BlockSpec((XP, NP), lambda i: (0, 0),
                         pipeline_mode=pl.Buffered(1)),
            pl.BlockSpec((NP, NP), lambda i: (0, 0),
                         pipeline_mode=pl.Buffered(1)),
            pl.BlockSpec((NP, ZP), lambda i: (0, 0),
                         pipeline_mode=pl.Buffered(1)),
            pl.BlockSpec((1, 2 * NP + ZP), lambda i: (0, 0),
                         pipeline_mode=pl.Buffered(1)),
        ],
        out_specs=pl.BlockSpec((TB, ZP), lambda i: (i, 0)),
        compiler_params=pltpu.CompilerParams(**cp_kwargs),
        cost_estimate=pl.CostEstimate(
            flops=flops, transcendentals=0, bytes_accessed=bytes_accessed),
    )(xp, w1p, w2p, w3p, bcat)

    # Slice the lane/batch padding back off (inside the same jit).
    return out[:B, :z_dim]


def q_net_forward(x, prepared_params, *, block_batch=512):
    """x: [B, X_dim]; prepared_params from prepare_params(). Returns [B, z_dim] f32."""
    if block_batch <= 0 or block_batch % 16 != 0:
        raise ValueError("block_batch must be a positive multiple of 16 "
                         "(bf16 sublane packing).")
    (w1p, w2p, w3p, bcat), dims = prepared_params
    return _q_net_forward_impl(x, w1p, w2p, w3p, bcat,
                               z_dim=dims["z_dim"], block_batch=block_batch)


def init_params(key, X_dim, N, z_dim, dtype=jnp.float32):
    """Deterministic nn.Linear-style init; weights returned as [in, out]."""
    ks = jax.random.split(key, 6)

    def linear(kw, kb, fan_in, fan_out):
        bound = 1.0 / jnp.sqrt(fan_in)
        # PyTorch stores weight as (out, in); we transpose to (in, out).
        w = jax.random.uniform(kw, (fan_out, fan_in), dtype, -bound, bound).T
        b = jax.random.uniform(kb, (fan_out,), dtype, -bound, bound)
        return w, b

    w1, b1 = linear(ks[0], ks[1], X_dim, N)
    w2, b2 = linear(ks[2], ks[3], N, N)
    w3, b3 = linear(ks[4], ks[5], N, z_dim)
    return w1, b1, w2, b2, w3, b3


if __name__ == "__main__":
    X_dim, N, z_dim = 32, 32, 8
    batch = 32

    key = jax.random.PRNGKey(0)
    kx, kp = jax.random.split(key)
    x = jax.random.normal(kx, (batch, X_dim), jnp.float32)
    w1, b1, w2, b2, w3, b3 = init_params(kp, X_dim, N, z_dim)

    # One-time weight preparation (padding + bf16 cast happens here, not per call).
    prepared = prepare_params(w1, b1, w2, b2, w3, b3)

    # 1) Whole-batch single grid step (default big tile).
    out = q_net_forward(x, prepared)
    out = jax.block_until_ready(out)
    assert out.shape == (batch, z_dim)

    # 2) Exercise the multi-step grid path as well (2 batch tiles of 16).
    out_tiled = q_net_forward(x, prepared, block_batch=16)
    out_tiled = jax.block_until_ready(out_tiled)

    # Reference matching the kernel's numerics (bf16 operands, f32 accumulate).
    def bf(v):
        return v.astype(jnp.bfloat16).astype(jnp.float32)

    h = jnp.maximum(bf(x) @ bf(w1) + b1, 0.0)
    h = jnp.maximum(bf(h) @ bf(w2) + b2, 0.0)
    ref_bf16 = bf(h) @ bf(w3) + b3
    assert jnp.allclose(out, ref_bf16, atol=5e-3, rtol=5e-3)
    assert jnp.allclose(out_tiled, ref_bf16, atol=5e-3, rtol=5e-3)

    # Sanity vs pure-f32 reference (loose tolerance: bf16 operand rounding).
    ref = jnp.maximum(x @ w1 + b1, 0.0)
    ref = jnp.maximum(ref @ w2 + b2, 0.0)
    ref = ref @ w3 + b3
    assert jnp.allclose(out, ref, atol=1e-1, rtol=5e-2)

    print("KERNEL_OK")
</pallas_src>

<mosaic_0001>
module attributes {stable_mosaic.version = 11 : i64} {
  func.func @_qnet_kernel(%arg0: i32, %arg1: memref<32x128xbf16, #tpu.memory_space<vmem>>, %arg2: memref<128x128xbf16, #tpu.memory_space<vmem>>, %arg3: memref<128x128xbf16, #tpu.memory_space<vmem>>, %arg4: memref<128x128xbf16, #tpu.memory_space<vmem>>, %arg5: memref<1x384xf32, #tpu.memory_space<vmem>>, %arg6: memref<32x128xf32, #tpu.memory_space<vmem>>) attributes {dimension_semantics = [#tpu.dimension_semantics<parallel>], iteration_bounds = array<i64: 1>, scalar_prefetch = 0 : i64, scratch_operands = 0 : i64, tpu.core_type = #tpu.core_type<tc>, window_params = [{transform_indices = @transform_0, window_bounds = array<i64: 32, 128>}, {pipeline_mode = #tpu.pipeline_mode<synchronous>, transform_indices = @transform_1, window_bounds = array<i64: 128, 128>}, {pipeline_mode = #tpu.pipeline_mode<synchronous>, transform_indices = @transform_2, window_bounds = array<i64: 128, 128>}, {pipeline_mode = #tpu.pipeline_mode<synchronous>, transform_indices = @transform_3, window_bounds = array<i64: 128, 128>}, {pipeline_mode = #tpu.pipeline_mode<synchronous>, transform_indices = @transform_4, window_bounds = array<i64: 1, 384>}, {transform_indices = @transform_5, window_bounds = array<i64: 32, 128>}]} {
    %c0 = arith.constant 0 : index
    %c0_0 = arith.constant 0 : index
    %0 = vector.load %arg1[%c0, %c0_0] : memref<32x128xbf16, #tpu.memory_space<vmem>>, vector<32x128xbf16>
    %c0_1 = arith.constant 0 : index
    %c0_2 = arith.constant 0 : index
    %1 = vector.load %arg5[%c0_1, %c0_2] : memref<1x384xf32, #tpu.memory_space<vmem>>, vector<1x128xf32>
    %c0_3 = arith.constant 0 : index
    %c128 = arith.constant 128 : index
    %2 = vector.load %arg5[%c0_3, %c128] : memref<1x384xf32, #tpu.memory_space<vmem>>, vector<1x128xf32>
    %c0_4 = arith.constant 0 : index
    %c256 = arith.constant 256 : index
    %3 = vector.load %arg5[%c0_4, %c256] : memref<1x384xf32, #tpu.memory_space<vmem>>, vector<1x128xf32>
    %c0_5 = arith.constant 0 : index
    %c0_6 = arith.constant 0 : index
    %4 = vector.load %arg2[%c0_5, %c0_6] : memref<128x128xbf16, #tpu.memory_space<vmem>>, vector<128x128xbf16>
    %cst = arith.constant dense<0.000000e+00> : vector<32x128xf32>
    %5 = tpu.matmul %0, %4, %cst {dimension_numbers = #tpu.dot_dimension_numbers<[1], [0], [0], [1], [0, 0, 1, 1], [], []>} : vector<32x128xbf16>, vector<128x128xbf16>, vector<32x128xf32> -> vector<32x128xf32>
    %6 = vector.broadcast %1 : vector<1x128xf32> to vector<32x128xf32>
    %7 = arith.addf %5, %6 : vector<32x128xf32>
    %cst_7 = arith.constant 0.000000e+00 : f32
    %8 = vector.broadcast %cst_7 : f32 to vector<32x128xf32>
    %9 = arith.maximumf %7, %8 : vector<32x128xf32>
    %10 = arith.truncf %9 : vector<32x128xf32> to vector<32x128xbf16>
    %c0_8 = arith.constant 0 : index
    %c0_9 = arith.constant 0 : index
    %11 = vector.load %arg3[%c0_8, %c0_9] : memref<128x128xbf16, #tpu.memory_space<vmem>>, vector<128x128xbf16>
    %cst_10 = arith.constant dense<0.000000e+00> : vector<32x128xf32>
    %12 = tpu.matmul %10, %11, %cst_10 {dimension_numbers = #tpu.dot_dimension_numbers<[1], [0], [0], [1], [0, 0, 1, 1], [], []>} : vector<32x128xbf16>, vector<128x128xbf16>, vector<32x128xf32> -> vector<32x128xf32>
    %13 = vector.broadcast %2 : vector<1x128xf32> to vector<32x128xf32>
    %14 = arith.addf %12, %13 : vector<32x128xf32>
    %cst_11 = arith.constant 0.000000e+00 : f32
    %15 = vector.broadcast %cst_11 : f32 to vector<32x128xf32>
    %16 = arith.maximumf %14, %15 : vector<32x128xf32>
    %17 = arith.truncf %16 : vector<32x128xf32> to vector<32x128xbf16>
    %c0_12 = arith.constant 0 : index
    %c0_13 = arith.constant 0 : index
    %18 = vector.load %arg4[%c0_12, %c0_13] : memref<128x128xbf16, #tpu.memory_space<vmem>>, vector<128x128xbf16>
    %cst_14 = arith.constant dense<0.000000e+00> : vector<32x128xf32>
    %19 = tpu.matmul %17, %18, %cst_14 {dimension_numbers = #tpu.dot_dimension_numbers<[1], [0], [0], [1], [0, 0, 1, 1], [], []>} : vector<32x128xbf16>, vector<128x128xbf16>, vector<32x128xf32> -> vector<32x128xf32>
    %20 = vector.broadcast %3 : vector<1x128xf32> to vector<32x128xf32>
    %21 = arith.addf %19, %20 : vector<32x128xf32>
    %c0_15 = arith.constant 0 : index
    %c0_16 = arith.constant 0 : index
    %22 = vector.load %arg6[%c0_15, %c0_16] : memref<32x128xf32, #tpu.memory_space<vmem>>, vector<32x128xf32>
    tpu.vector_store %arg6[%c0_15, %c0_16], %21 {strides = array<i32>} : memref<32x128xf32, #tpu.memory_space<vmem>>, vector<32x128xf32>,
    return
  }
  func.func @transform_0(%arg0: i32) -> (i32, i32) {
    %c0_i32 = arith.constant 0 : i32
    %c0_i32_0 = arith.constant 0 : i32
    return %arg0, %c0_i32 : i32, i32
  }
  func.func @transform_1(%arg0: i32) -> (i32, i32) {
    %c0_i32 = arith.constant 0 : i32
    %c0_i32_0 = arith.constant 0 : i32
    %c0_i32_1 = arith.constant 0 : i32
    return %c0_i32, %c0_i32_0 : i32, i32
  }
  func.func @transform_2(%arg0: i32) -> (i32, i32) {
    %c0_i32 = arith.constant 0 : i32
    %c0_i32_0 = arith.constant 0 : i32
    %c0_i32_1 = arith.constant 0 : i32
    return %c0_i32, %c0_i32_0 : i32, i32
  }
  func.func @transform_3(%arg0: i32) -> (i32, i32) {
    %c0_i32 = arith.constant 0 : i32
    %c0_i32_0 = arith.constant 0 : i32
    %c0_i32_1 = arith.constant 0 : i32
    return %c0_i32, %c0_i32_0 : i32, i32
  }
  func.func @transform_4(%arg0: i32) -> (i32, i32) {
    %c0_i32 = arith.constant 0 : i32
    %c0_i32_0 = arith.constant 0 : i32
    %c0_i32_1 = arith.constant 0 : i32
    return %c0_i32, %c0_i32_0 : i32, i32
  }
  func.func @transform_5(%arg0: i32) -> (i32, i32) {
    %c0_i32 = arith.constant 0 : i32
    %c0_i32_0 = arith.constant 0 : i32
    return %arg0, %c0_i32 : i32, i32
  }
}

</mosaic_0001>

<bundles_post_ra>
// kernel: _q_net_forward_impl.1
= control target key start
LH: loop header
LB: loop body
LE: loop exit
PB: predicated region body
PF: predicated region fallthrough
CT: control target
= control target key end

     0   :  { %10 = vsyncpa [#allocation3], 0  ;;  %s731_s0 = inlined_call_operand.vmem [shape: bf16[32,128], index: 0, kind: input, shape index: {}]   ;;  %s732_s1 = inlined_call_operand.vmem [shape: bf16[128,128], index: 1, kind: input, shape index: {}]   ;;  %s733_s2 = inlined_call_operand.hbm [shape: bf16[128,128], index: 2, kind: input, shape index: {}]   ;;  %s734_s3 = inlined_call_operand.hbm [shape: bf16[128,128], index: 3, kind: input, shape index: {}]   ;;  %s735_s4 = inlined_call_operand.vmem [shape: f32[1,384], index: 4, kind: input, shape index: {}]   ;;  %s736_s5 = inlined_call_operand.vmem [shape: f32[32,128], index: 5, kind: output, shape index: {}]  }
   0x1   :  { %11 = vsyncpa [#allocation5], 0  ;;  %s640_s18 = smov [#allocation2]  }
   0x2   :  { %s21_s19 = sshll.u32 %s640_s18, 4  ;;  %s22_s19 = int_to_ptr.vmem [resolvable:$true] %s21_s19 }
   0x3   :  { %s604_s20 = scalar_lea.vmem %s22_s19, 1024  ;;  %p609_p1 = scmp.lt.s32.totalorder %s22_s19, %s22_s19 }
   0x4   :  { %p605_p0 = scmp.ne.s32.totalorder %s22_s19, %s604_s20  ;;  %p610_p2 = scmp.lt.s32.totalorder %s604_s20, %s604_s20 }
   0x6   :  { %p611_p3 = por %p610_p2, %p609_p1 }
   0x8   :  { %p612_p4 = pnand %p611_p3, %p605_p0 }
   0xa   :  { %615 = shalt.err (!%p612_p4)
}
   0xb   :  { %s641_s21 = smov 64   ;;  %s642_s22 = smov 4  }
   0xc   :  { %27 = dma.hbm_to_vmem [thread:$0]  %s733_s2, 1024, %s22_s19, [#allocation3], %s641_s21, %s641_s21, %s642_s22  }
   0xd   :  { %s643_s25 = smov [#allocation4]  }
   0xe   :  { %s33_s26 = sshll.u32 %s643_s25, 4  ;;  %s34_s26 = int_to_ptr.vmem [resolvable:$true] %s33_s26 }
   0xf   :  { %s624_s27 = scalar_lea.vmem %s34_s26, 1024  ;;  %p629_p6 = scmp.lt.s32.totalorder %s34_s26, %s34_s26 }
  0x10   :  { %p625_p5 = scmp.ne.s32.totalorder %s34_s26, %s624_s27  ;;  %p630_p7 = scmp.lt.s32.totalorder %s624_s27, %s624_s27 }
  0x12   :  { %p631_p8 = por %p630_p7, %p629_p6 }
  0x14   :  { %p632_p9 = pnand %p631_p8, %p625_p5 }
  0x16   :  { %635 = shalt.err (!%p632_p9)
}
  0x17   :  { %39 = dma.hbm_to_vmem [thread:$0]  %s734_s3, 1024, %s34_s26, [#allocation5], %s641_s21, %s641_s21, %s642_s22  }
  0x18   :  { %636 = dma.done.wait [#allocation3], 1024  }
  0x19   :  { %637 = vsyncadd [#allocation3], 4294966272 }
  0x1a   :  { %638 = dma.done.wait [#allocation5], 1024  }
  0x1b   :  { %639 = vsyncadd [#allocation5], 4294966272  ;;  %v570_v0 = vld [vmem:[%s732_s1 + $0x38] sm:$0xff]   ;;  %v571_v1 = vld [vmem:[%s732_s1 + $0x30] sm:$0xff]  }
  0x1c   :  { %506 = vmatprep.subr.bf16.mxu0 %v570_v0  ;;  %v572_v2 = vld [vmem:[%s732_s1 + $0x28] sm:$0xff]   ;;  %v573_v3 = vld [vmem:[%s732_s1 + $0x20] sm:$0xff]   ;;  %v580_v5 = vld [vmem:[#allocation2 + $0x38] sm:$0xff]  }
  0x1d   :  { %507 = vmatpush3.bf16.msra.mxu0 %v570_v0  ;;  %v578_v4 = vld [vmem:[%s731_s0] sm:$0xff]   ;;  %v581_v6 = vld [vmem:[#allocation2 + $0x30] sm:$0xff]   ;;  %v574_v7 = vld [vmem:[%s732_s1 + $0x18] sm:$0xff]   ;;  %526 = vmatprep.subr.bf16.mxu1 %v580_v5 }
  0x1e   :  { %508 = vmatprep.subr.bf16.mxu0 %v571_v1  ;;  %522 = vmatprep.mubr.bf16.mxu0 %v578_v4  ;;  %v575_v8 = vld [vmem:[%s732_s1 + $0x10] sm:$0xff]   ;;  %v582_v9 = vld [vmem:[#allocation2 + $0x28] sm:$0xff]   ;;  %v583_v10 = vld [vmem:[#allocation2 + $0x20] sm:$0xff]  }
  0x1f   :  { %527 = vmatpush3.bf16.msra.mxu1 %v580_v5  ;;  %v576_v11 = vld [vmem:[%s732_s1 + $0x8] sm:$0xff]   ;;  %v584_v12 = vld [vmem:[#allocation2 + $0x18] sm:$0xff]   ;;  %v577_v13 = vld [vmem:[%s732_s1] sm:$0xff]  }
  0x20   :  { %528 = vmatprep.subr.bf16.mxu1 %v581_v6  ;;  %v579_v14 = vld [vmem:[%s731_s0 + $0x8] sm:$0xff]   ;;  %v585_v15 = vld [vmem:[#allocation2 + $0x10] sm:$0xff]   ;;  %v587_v17 = vld [vmem:[#allocation2] sm:$0xff]  }
  0x21   :  { %509 = vmatpush3.bf16.msra.mxu0 %v571_v1  ;;  %v586_v16 = vld [vmem:[#allocation2 + $0x8] sm:$0xff]   ;;  %v588_v18 = vld [vmem:[#allocation4 + $0x38] sm:$0xff]   ;;  %v589_v19 = vld [vmem:[#allocation4 + $0x30] sm:$0xff]  }
  0x22   :  { %510 = vmatprep.subr.bf16.mxu0 %v572_v2  ;;  %v590_v20 = vld [vmem:[#allocation4 + $0x28] sm:$0xff]   ;;  %v591_v21 = vld [vmem:[#allocation4 + $0x20] sm:$0xff]   ;;  %v592_v22 = vld [vmem:[#allocation4 + $0x18] sm:$0xff]  }
  0x23   :  { %529 = vmatpush3.bf16.msra.mxu1 %v581_v6  ;;  %v447_v25 = vld [vmem:[%s735_s4] ss:$0 sm:$0xff]  ;;  %v593_v38 = vld [vmem:[#allocation4 + $0x10] sm:$0xff]   ;;  %v594_v39 = vld [vmem:[#allocation4 + $0x8] sm:$0xff]  }
  0x24   :  { %530 = vmatprep.subr.bf16.mxu1 %v582_v9  ;;  %v595_v40 = vld [vmem:[#allocation4] sm:$0xff]  }
  0x25   :  { %511 = vmatpush3.bf16.msra.mxu0 %v572_v2  ;;  %v458_v43 = vld [vmem:[%s735_s4 + $0x1] ss:$0 sm:$0xff]  ;;  %v467_v56 = vld [vmem:[%s735_s4 + $0x2] ss:$0 sm:$0xff] }
  0x26   :  { %512 = vmatprep.subr.bf16.mxu0 %v573_v3 }
  0x27   :  { %531 = vmatpush3.bf16.msra.mxu1 %v582_v9 }
  0x28   :  { %532 = vmatprep.subr.bf16.mxu1 %v583_v10 }
  0x29   :  { %513 = vmatpush3.bf16.msra.mxu0 %v573_v3 }
  0x2a   :  { %514 = vmatprep.subr.bf16.mxu0 %v574_v7 }
  0x2b   :  { %533 = vmatpush3.bf16.msra.mxu1 %v583_v10 }
  0x2c   :  { %534 = vmatprep.subr.bf16.mxu1 %v584_v12 }
  0x2d   :  { %515 = vmatpush3.bf16.msra.mxu0 %v574_v7 }
  0x2e   :  { %516 = vmatprep.subr.bf16.mxu0 %v575_v8 }
  0x2f   :  { %535 = vmatpush3.bf16.msra.mxu1 %v584_v12 }
  0x30   :  { %536 = vmatprep.subr.bf16.mxu1 %v585_v15 }
  0x31   :  { %517 = vmatpush3.bf16.msra.mxu0 %v575_v8 }
  0x32   :  { %518 = vmatprep.subr.bf16.mxu0 %v576_v11 }
  0x33   :  { %537 = vmatpush3.bf16.msra.mxu1 %v585_v15 }
  0x34   :  { %538 = vmatprep.subr.bf16.mxu1 %v586_v16 }
  0x35   :  { %519 = vmatpush3.bf16.msra.mxu0 %v576_v11 }
  0x36   :  { %520 = vmatprep.subr.bf16.mxu0 %v577_v13 }
  0x37   :  { %539 = vmatpush3.bf16.msra.mxu1 %v586_v16 }
  0x38   :  { %540 = vmatprep.subr.bf16.mxu1 %v587_v17 }
  0x39   :  { %521 = vmatpush3.bf16.msra.mxu0 %v577_v13 }
  0x3a   :  { %546 = vmatprep.subr.bf16.mxu0 %v588_v18 }
  0x3b   :  { %541 = vmatpush3.bf16.msra.mxu1 %v587_v17 }
  0x3c   :  { %523 = vmatmul.mubr.bf16.vlgmr.msra.gmra.mxu0 %v579_v14 }
  0x3d   :  { %547 = vmatpush3.bf16.msra.mxu0 %v588_v18 }
  0x3e   :  { %548 = vmatprep.subr.bf16.mxu0 %v589_v19 }
  0x41   :  { %549 = vmatpush3.bf16.msra.mxu0 %v589_v19 }
  0x42   :  { %550 = vmatprep.subr.bf16.mxu0 %v590_v20 }
  0x45   :  { %551 = vmatpush3.bf16.msra.mxu0 %v590_v20 }
  0x46   :  { %552 = vmatprep.subr.bf16.mxu0 %v591_v21 }
  0x49   :  { %553 = vmatpush3.bf16.msra.mxu0 %v591_v21 }
  0x4a   :  { %554 = vmatprep.subr.bf16.mxu0 %v592_v22 }
  0x4d   :  { %555 = vmatpush3.bf16.msra.mxu0 %v592_v22 }
  0x4e   :  { %556 = vmatprep.subr.bf16.mxu0 %v593_v38 }
  0x51   :  { %557 = vmatpush3.bf16.msra.mxu0 %v593_v38 }
  0x52   :  { %558 = vmatprep.subr.bf16.mxu0 %v594_v39 }
  0x55   :  { %559 = vmatpush3.bf16.msra.mxu0 %v594_v39 }
  0x56   :  { %560 = vmatprep.subr.bf16.mxu0 %v595_v40 }
  0x59   :  { %561 = vmatpush3.bf16.msra.mxu0 %v595_v40 }
  0xfc   :  { %v524_v23 = vpop.f32.mrf.mxu0 }
  0xfd   :  { %v181_v29 = vadd.f32 %v524_v23, %v447_v25 }
  0xfe   :  { %v172_v24 = vpop.f32.mrf.mxu0 }
  0xff   :  { %v173_v27 = vadd.f32 %v447_v25, %v172_v24  ;;  %v189_v35 = vmax.f32 %v181_v29, 0.0 }
 0x100   :  { %v525_v26 = vpop.f32.mrf.mxu0 }
 0x101   :  { %v184_v28 = vadd.f32 %v525_v26, %v447_v25  ;;  %v187_v33 = vmax.f32 %v173_v27, 0.0 }
 0x102   :  { %v175_v30 = vpop.f32.mrf.mxu0 }
 0x103   :  { %v176_v31 = vadd.f32 %v447_v25, %v175_v30  ;;  %v190_v32 = vmax.f32 %v184_v28, 0.0 }
 0x105   :  { %v188_v34 = vmax.f32 %v176_v31, 0.0  ;;  %v192_v37 = vpack.c.bf16 %v190_v32, %v189_v35 }
 0x107   :  { %v191_v36 = vpack.c.bf16 %v188_v34, %v187_v33 }
 0x109   :  { %542 = vmatprep.mubr.bf16.mxu1 %v191_v36 }
 0x10a   :  { %543 = vmatmul.mubr.bf16.vlgmr.msra.gmra.mxu1 %v192_v37 }
 0x1ca   :  { %v544_v41 = vpop.f32.mrf.mxu1 }
 0x1cb   :  { %v306_v47 = vadd.f32 %v544_v41, %v458_v43 }
 0x1cc   :  { %v297_v42 = vpop.f32.mrf.mxu1 }
 0x1cd   :  { %v298_v45 = vadd.f32 %v458_v43, %v297_v42  ;;  %v314_v53 = vmax.f32 %v306_v47, 0.0 }
 0x1ce   :  { %v545_v44 = vpop.f32.mrf.mxu1 }
 0x1cf   :  { %v309_v46 = vadd.f32 %v545_v44, %v458_v43  ;;  %v312_v51 = vmax.f32 %v298_v45, 0.0 }
 0x1d0   :  { %v300_v48 = vpop.f32.mrf.mxu1 }
 0x1d1   :  { %v301_v49 = vadd.f32 %v458_v43, %v300_v48  ;;  %v315_v50 = vmax.f32 %v309_v46, 0.0 }
 0x1d3   :  { %v313_v52 = vmax.f32 %v301_v49, 0.0  ;;  %v317_v55 = vpack.c.bf16 %v315_v50, %v314_v53 }
 0x1d5   :  { %v316_v54 = vpack.c.bf16 %v313_v52, %v312_v51 }
 0x1d7   :  { %562 = vmatprep.mubr.bf16.mxu0 %v316_v54 }
 0x1d8   :  { %563 = vmatmul.mubr.bf16.vlgmr.msra.gmra.mxu0 %v317_v55 }
 0x298   :  { %v564_v57 = vpop.f32.mrf.mxu0 }
 0x299   :  { %v431_v58 = vadd.f32 %v564_v57, %v467_v56 }
 0x29a   :  { %v422_v59 = vpop.f32.mrf.mxu0 }
 0x29b   :  { %439 = vst [vmem:[%s736_s5 + $0x10] sm:$0xff] %v431_v58  ;;  %v423_v60 = vadd.f32 %v467_v56, %v422_v59 }
 0x29c   :  { %v565_v61 = vpop.f32.mrf.mxu0 }
 0x29d   :  { %437 = vst [vmem:[%s736_s5] sm:$0xff] %v423_v60  ;;  %v434_v62 = vadd.f32 %v565_v61, %v467_v56 }
 0x29e   :  { %v425_v63 = vpop.f32.mrf.mxu0 }
 0x29f   :  { %440 = vst [vmem:[%s736_s5 + $0x18] sm:$0xff] %v434_v62  ;;  %v426_v0 = vadd.f32 %v467_v56, %v425_v63 }
 0x2a1   :  { %438 = vst [vmem:[%s736_s5 + $0x8] sm:$0xff] %v426_v0 }
 0x2a2   :  { %445 = vsyncpa [#allocation3], 1 }
 0x2a3   :  { %446 = vsyncpa [#allocation5], 1 }

</bundles_post_ra>
